<compile_context>
chip_gen: v7x
topology: tpu7x:2x2x1
jax: 0.10.0
libtpu: 0.0.40
codegen_flags: <defaults>
</compile_context>

<pallas_src>
import jax
import jax.numpy as jnp
import numpy as np
from jax.experimental import pallas as pl
from jax.experimental.pallas import tpu as pltpu

N_FEATURES = 2
N_BLOCKS = 4
N_UNITS = 64

P = 4            # batch rows packed into the lane axis (block-diag weights)
TM_MAX = 2048    # max batch rows per grid step (multiple of 8*P)
MXU_DTYPE = jnp.bfloat16   # matmul operand dtype (accumulation stays f32)


def _round_up(n, m):
    return ((n + m - 1) // m) * m


def _block_diag(w, p):
    """block_diag(w, ..., w) with p copies; w is (fan_in, fan_out)."""
    fi, fo = w.shape
    out = jnp.zeros((p * fi, p * fo), w.dtype)
    for k in range(p):
        out = out.at[k * fi:(k + 1) * fi, k * fo:(k + 1) * fo].set(w)
    return out


def _diffusion_kernel(x_ref, t_ref,
                      wx_ref, wt_ref, b_in_ref,
                      w0_ref, b0_ref, w1_ref, b1_ref,
                      w2_ref, b2_ref, w3_ref, b3_ref,
                      w_out_ref, b_out_ref,
                      o_ref):
    """Whole MLP for one lane-packed batch tile; all weights resident in VMEM."""
    xp = x_ref[...]                                   # (tm/P, P*n_feat) f32
    tp = t_ref[...]                                   # (tm/P, P)        f32

    # inblock: Linear only (no activation, matches the PyTorch forward).
    # h = [x|t] @ W_in + b_in, split into an x matmul and a (tiny) t matmul.
    h = jnp.dot(xp.astype(MXU_DTYPE), wx_ref[...],
                preferred_element_type=jnp.float32)
    h = h + jnp.dot(tp.astype(MXU_DTYPE), wt_ref[...],
                    preferred_element_type=jnp.float32)
    h = h + b_in_ref[...]                             # (tm/P, P*n_units) f32

    # diffusion blocks: Linear + ReLU (bf16 MXU operands, f32 accumulate/epilogue)
    for w_ref, b_ref in ((w0_ref, b0_ref), (w1_ref, b1_ref),
                         (w2_ref, b2_ref), (w3_ref, b3_ref)):
        h = jnp.dot(h.astype(MXU_DTYPE), w_ref[...],
                    preferred_element_type=jnp.float32)
        h = jnp.maximum(h + b_ref[...], 0.0)

    # outblock: Linear only
    out = jnp.dot(h.astype(MXU_DTYPE), w_out_ref[...],
                  preferred_element_type=jnp.float32)
    out = out + b_out_ref[...]                        # (tm/P, P*n_features)
    o_ref[...] = out.astype(o_ref.dtype)


@jax.jit
def diffusion_forward(x, t, params):
    """x: (N, n_features), t: (N, 1). Returns (N, n_features)."""
    n, n_feat = x.shape
    (w_in, b_in), blocks, (w_out, b_out) = params
    n_units = w_in.shape[1]

    # --- choose batch tile: large to amortize per-step cost, small-batch safe ---
    row_align = 8 * P                       # packed-row (sublane) alignment
    tm = min(TM_MAX, _round_up(n, row_align))
    n_pad = _round_up(n, tm)
    if n_pad != n:                          # rows are independent; pad batch
        x = jnp.pad(x, ((0, n_pad - n), (0, 0)))
        t = jnp.pad(t, ((0, n_pad - n), (0, 0)))

    # --- lane-pack P consecutive batch rows (row-major reshape = free) ---
    xp = x.reshape(n_pad // P, P * n_feat)  # (rows, P*n_feat)
    tp = t.reshape(n_pad // P, P)           # (rows, P)

    # --- block-diagonal weights / tiled biases (built once, tiny) ---
    w_x = w_in[:n_feat]                     # (n_feat, n_units)
    w_t = w_in[n_feat:]                     # (1, n_units)

    def blk(w):
        return _block_diag(w, P).astype(MXU_DTYPE)

    def tile_b(b):
        return jnp.tile(b, (1, P)).astype(jnp.float32)

    flat_params = [blk(w_x), blk(w_t), tile_b(b_in)]
    for w, b in blocks:
        flat_params += [blk(w), tile_b(b)]
    flat_params += [blk(w_out), tile_b(b_out)]

    rows = n_pad // P
    tm_p = tm // P
    grid = (n_pad // tm,)

    def wspec(a):
        # weights / biases: single full-array block, same for every grid step
        return pl.BlockSpec(a.shape, lambda i: (0, 0))

    out = pl.pallas_call(
        _diffusion_kernel,
        out_shape=jax.ShapeDtypeStruct((rows, P * n_feat), jnp.float32),
        grid_spec=pltpu.PrefetchScalarGridSpec(
            num_scalar_prefetch=0,
            grid=grid,
            in_specs=[pl.BlockSpec((tm_p, P * n_feat), lambda i: (i, 0)),
                      pl.BlockSpec((tm_p, P), lambda i: (i, 0))]
                     + [wspec(a) for a in flat_params],
            out_specs=pl.BlockSpec((tm_p, P * n_feat), lambda i: (i, 0)),
        ),
        compiler_params=pltpu.CompilerParams(
            dimension_semantics=("parallel",)),
    )(xp, tp, *flat_params)

    # unpack lanes back to (n_pad, n_feat) (row-major reshape = free), drop pad
    return out.reshape(n_pad, n_feat)[:n]


def init_params(key, n_features=N_FEATURES, n_blocks=N_BLOCKS, n_units=N_UNITS):
    """Deterministic init mimicking nn.Linear (uniform +/- 1/sqrt(fan_in)).
    Weights stored as (in_features, out_features)."""
    def linear(k, fan_in, fan_out):
        kw, kb = jax.random.split(k)
        bound = 1.0 / np.sqrt(fan_in)
        w = jax.random.uniform(kw, (fan_in, fan_out), jnp.float32, -bound, bound)
        b = jax.random.uniform(kb, (1, fan_out), jnp.float32, -bound, bound)
        return w, b

    keys = jax.random.split(key, n_blocks + 2)
    inblock = linear(keys[0], n_features + 1, n_units)
    blocks = [linear(keys[1 + i], n_units, n_units) for i in range(n_blocks)]
    outblock = linear(keys[-1], n_units, n_features)
    return inblock, blocks, outblock


def reference_forward(x, t, params):
    """Pure-JAX f32 reference for validation."""
    (w_in, b_in), blocks, (w_out, b_out) = params
    h = jnp.concatenate([x, t], axis=1) @ w_in + b_in
    for w, b in blocks:
        h = jnp.maximum(h @ w + b, 0.0)
    return h @ w_out + b_out


if __name__ == "__main__":
    key = jax.random.PRNGKey(0)
    k_params, k_x, k_t = jax.random.split(key, 3)

    params = init_params(k_params)

    batch = 8
    x = jax.random.normal(k_x, (batch, N_FEATURES), dtype=jnp.float32)
    t = jax.random.uniform(k_t, (batch, 1), dtype=jnp.float32)

    out = diffusion_forward(x, t, params)
    out = jax.block_until_ready(out)

    ref = reference_forward(x, t, params)
    # bf16 MXU operands (f32 accumulation) => loosened tolerance vs f32 reference
    np.testing.assert_allclose(np.asarray(out), np.asarray(ref),
                               rtol=2e-2, atol=2e-2)
    assert out.shape == (batch, N_FEATURES)
    print("KERNEL_OK")
</pallas_src>

<mosaic_0001>
module attributes {stable_mosaic.version = 11 : i64} {
  func.func @_diffusion_kernel(%arg0: i32, %arg1: memref<8x8xf32, #tpu.memory_space<vmem>>, %arg2: memref<8x4xf32, #tpu.memory_space<vmem>>, %arg3: memref<8x256xbf16, #tpu.memory_space<vmem>>, %arg4: memref<4x256xbf16, #tpu.memory_space<vmem>>, %arg5: memref<1x256xf32, #tpu.memory_space<vmem>>, %arg6: memref<256x256xbf16, #tpu.memory_space<vmem>>, %arg7: memref<1x256xf32, #tpu.memory_space<vmem>>, %arg8: memref<256x256xbf16, #tpu.memory_space<vmem>>, %arg9: memref<1x256xf32, #tpu.memory_space<vmem>>, %arg10: memref<256x256xbf16, #tpu.memory_space<vmem>>, %arg11: memref<1x256xf32, #tpu.memory_space<vmem>>, %arg12: memref<256x256xbf16, #tpu.memory_space<vmem>>, %arg13: memref<1x256xf32, #tpu.memory_space<vmem>>, %arg14: memref<256x8xbf16, #tpu.memory_space<vmem>>, %arg15: memref<1x8xf32, #tpu.memory_space<vmem>>, %arg16: memref<8x8xf32, #tpu.memory_space<vmem>>) attributes {dimension_semantics = [#tpu.dimension_semantics<parallel>], iteration_bounds = array<i64: 1>, scalar_prefetch = 0 : i64, scratch_operands = 0 : i64, tpu.core_type = #tpu.core_type<tc>, window_params = [{transform_indices = @transform_0, window_bounds = array<i64: 8, 8>}, {transform_indices = @transform_1, window_bounds = array<i64: 8, 4>}, {pipeline_mode = #tpu.pipeline_mode<synchronous>, transform_indices = @transform_2, window_bounds = array<i64: 8, 256>}, {pipeline_mode = #tpu.pipeline_mode<synchronous>, transform_indices = @transform_3, window_bounds = array<i64: 4, 256>}, {pipeline_mode = #tpu.pipeline_mode<synchronous>, transform_indices = @transform_4, window_bounds = array<i64: 1, 256>}, {pipeline_mode = #tpu.pipeline_mode<synchronous>, transform_indices = @transform_5, window_bounds = array<i64: 256, 256>}, {pipeline_mode = #tpu.pipeline_mode<synchronous>, transform_indices = @transform_6, window_bounds = array<i64: 1, 256>}, {pipeline_mode = #tpu.pipeline_mode<synchronous>, transform_indices = @transform_7, window_bounds = array<i64: 256, 256>}, {pipeline_mode = #tpu.pipeline_mode<synchronous>, transform_indices = @transform_8, window_bounds = array<i64: 1, 256>}, {pipeline_mode = #tpu.pipeline_mode<synchronous>, transform_indices = @transform_9, window_bounds = array<i64: 256, 256>}, {pipeline_mode = #tpu.pipeline_mode<synchronous>, transform_indices = @transform_10, window_bounds = array<i64: 1, 256>}, {pipeline_mode = #tpu.pipeline_mode<synchronous>, transform_indices = @transform_11, window_bounds = array<i64: 256, 256>}, {pipeline_mode = #tpu.pipeline_mode<synchronous>, transform_indices = @transform_12, window_bounds = array<i64: 1, 256>}, {pipeline_mode = #tpu.pipeline_mode<synchronous>, transform_indices = @transform_13, window_bounds = array<i64: 256, 8>}, {pipeline_mode = #tpu.pipeline_mode<synchronous>, transform_indices = @transform_14, window_bounds = array<i64: 1, 8>}, {transform_indices = @transform_15, window_bounds = array<i64: 8, 8>}]} {
    %c0 = arith.constant 0 : index
    %c0_0 = arith.constant 0 : index
    %0 = vector.load %arg1[%c0, %c0_0] : memref<8x8xf32, #tpu.memory_space<vmem>>, vector<8x8xf32>
    %c0_1 = arith.constant 0 : index
    %c0_2 = arith.constant 0 : index
    %1 = vector.load %arg2[%c0_1, %c0_2] : memref<8x4xf32, #tpu.memory_space<vmem>>, vector<8x4xf32>
    %2 = arith.truncf %0 : vector<8x8xf32> to vector<8x8xbf16>
    %c0_3 = arith.constant 0 : index
    %c0_4 = arith.constant 0 : index
    %3 = vector.load %arg3[%c0_3, %c0_4] : memref<8x256xbf16, #tpu.memory_space<vmem>>, vector<8x256xbf16>
    %cst = arith.constant dense<0.000000e+00> : vector<8x256xf32>
    %4 = tpu.matmul %2, %3, %cst {dimension_numbers = #tpu.dot_dimension_numbers<[1], [0], [0], [1], [0, 0, 1, 1], [], []>} : vector<8x8xbf16>, vector<8x256xbf16>, vector<8x256xf32> -> vector<8x256xf32>
    %5 = arith.truncf %1 : vector<8x4xf32> to vector<8x4xbf16>
    %c0_5 = arith.constant 0 : index
    %c0_6 = arith.constant 0 : index
    %6 = vector.load %arg4[%c0_5, %c0_6] : memref<4x256xbf16, #tpu.memory_space<vmem>>, vector<4x256xbf16>
    %cst_7 = arith.constant dense<0.000000e+00> : vector<8x256xf32>
    %7 = tpu.matmul %5, %6, %cst_7 {dimension_numbers = #tpu.dot_dimension_numbers<[1], [0], [0], [1], [0, 0, 1, 1], [], []>} : vector<8x4xbf16>, vector<4x256xbf16>, vector<8x256xf32> -> vector<8x256xf32>
    %8 = arith.addf %4, %7 : vector<8x256xf32>
    %c0_8 = arith.constant 0 : index
    %c0_9 = arith.constant 0 : index
    %9 = vector.load %arg5[%c0_8, %c0_9] : memref<1x256xf32, #tpu.memory_space<vmem>>, vector<1x256xf32>
    %10 = vector.broadcast %9 : vector<1x256xf32> to vector<8x256xf32>
    %11 = arith.addf %8, %10 : vector<8x256xf32>
    %12 = arith.truncf %11 : vector<8x256xf32> to vector<8x256xbf16>
    %c0_10 = arith.constant 0 : index
    %c0_11 = arith.constant 0 : index
    %13 = vector.load %arg6[%c0_10, %c0_11] : memref<256x256xbf16, #tpu.memory_space<vmem>>, vector<256x256xbf16>
    %cst_12 = arith.constant dense<0.000000e+00> : vector<8x256xf32>
    %14 = tpu.matmul %12, %13, %cst_12 {dimension_numbers = #tpu.dot_dimension_numbers<[1], [0], [0], [1], [0, 0, 1, 1], [], []>} : vector<8x256xbf16>, vector<256x256xbf16>, vector<8x256xf32> -> vector<8x256xf32>
    %c0_13 = arith.constant 0 : index
    %c0_14 = arith.constant 0 : index
    %15 = vector.load %arg7[%c0_13, %c0_14] : memref<1x256xf32, #tpu.memory_space<vmem>>, vector<1x256xf32>
    %16 = vector.broadcast %15 : vector<1x256xf32> to vector<8x256xf32>
    %17 = arith.addf %14, %16 : vector<8x256xf32>
    %cst_15 = arith.constant 0.000000e+00 : f32
    %18 = vector.broadcast %cst_15 : f32 to vector<8x256xf32>
    %19 = arith.maximumf %17, %18 : vector<8x256xf32>
    %20 = arith.truncf %19 : vector<8x256xf32> to vector<8x256xbf16>
    %c0_16 = arith.constant 0 : index
    %c0_17 = arith.constant 0 : index
    %21 = vector.load %arg8[%c0_16, %c0_17] : memref<256x256xbf16, #tpu.memory_space<vmem>>, vector<256x256xbf16>
    %cst_18 = arith.constant dense<0.000000e+00> : vector<8x256xf32>
    %22 = tpu.matmul %20, %21, %cst_18 {dimension_numbers = #tpu.dot_dimension_numbers<[1], [0], [0], [1], [0, 0, 1, 1], [], []>} : vector<8x256xbf16>, vector<256x256xbf16>, vector<8x256xf32> -> vector<8x256xf32>
    %c0_19 = arith.constant 0 : index
    %c0_20 = arith.constant 0 : index
    %23 = vector.load %arg9[%c0_19, %c0_20] : memref<1x256xf32, #tpu.memory_space<vmem>>, vector<1x256xf32>
    %24 = vector.broadcast %23 : vector<1x256xf32> to vector<8x256xf32>
    %25 = arith.addf %22, %24 : vector<8x256xf32>
    %cst_21 = arith.constant 0.000000e+00 : f32
    %26 = vector.broadcast %cst_21 : f32 to vector<8x256xf32>
    %27 = arith.maximumf %25, %26 : vector<8x256xf32>
    %28 = arith.truncf %27 : vector<8x256xf32> to vector<8x256xbf16>
    %c0_22 = arith.constant 0 : index
    %c0_23 = arith.constant 0 : index
    %29 = vector.load %arg10[%c0_22, %c0_23] : memref<256x256xbf16, #tpu.memory_space<vmem>>, vector<256x256xbf16>
    %cst_24 = arith.constant dense<0.000000e+00> : vector<8x256xf32>
    %30 = tpu.matmul %28, %29, %cst_24 {dimension_numbers = #tpu.dot_dimension_numbers<[1], [0], [0], [1], [0, 0, 1, 1], [], []>} : vector<8x256xbf16>, vector<256x256xbf16>, vector<8x256xf32> -> vector<8x256xf32>
    %c0_25 = arith.constant 0 : index
    %c0_26 = arith.constant 0 : index
    %31 = vector.load %arg11[%c0_25, %c0_26] : memref<1x256xf32, #tpu.memory_space<vmem>>, vector<1x256xf32>
    %32 = vector.broadcast %31 : vector<1x256xf32> to vector<8x256xf32>
    %33 = arith.addf %30, %32 : vector<8x256xf32>
    %cst_27 = arith.constant 0.000000e+00 : f32
    %34 = vector.broadcast %cst_27 : f32 to vector<8x256xf32>
    %35 = arith.maximumf %33, %34 : vector<8x256xf32>
    %36 = arith.truncf %35 : vector<8x256xf32> to vector<8x256xbf16>
    %c0_28 = arith.constant 0 : index
    %c0_29 = arith.constant 0 : index
    %37 = vector.load %arg12[%c0_28, %c0_29] : memref<256x256xbf16, #tpu.memory_space<vmem>>, vector<256x256xbf16>
    %cst_30 = arith.constant dense<0.000000e+00> : vector<8x256xf32>
    %38 = tpu.matmul %36, %37, %cst_30 {dimension_numbers = #tpu.dot_dimension_numbers<[1], [0], [0], [1], [0, 0, 1, 1], [], []>} : vector<8x256xbf16>, vector<256x256xbf16>, vector<8x256xf32> -> vector<8x256xf32>
    %c0_31 = arith.constant 0 : index
    %c0_32 = arith.constant 0 : index
    %39 = vector.load %arg13[%c0_31, %c0_32] : memref<1x256xf32, #tpu.memory_space<vmem>>, vector<1x256xf32>
    %40 = vector.broadcast %39 : vector<1x256xf32> to vector<8x256xf32>
    %41 = arith.addf %38, %40 : vector<8x256xf32>
    %cst_33 = arith.constant 0.000000e+00 : f32
    %42 = vector.broadcast %cst_33 : f32 to vector<8x256xf32>
    %43 = arith.maximumf %41, %42 : vector<8x256xf32>
    %44 = arith.truncf %43 : vector<8x256xf32> to vector<8x256xbf16>
    %c0_34 = arith.constant 0 : index
    %c0_35 = arith.constant 0 : index
    %45 = vector.load %arg14[%c0_34, %c0_35] : memref<256x8xbf16, #tpu.memory_space<vmem>>, vector<256x8xbf16>
    %cst_36 = arith.constant dense<0.000000e+00> : vector<8x8xf32>
    %46 = tpu.matmul %44, %45, %cst_36 {dimension_numbers = #tpu.dot_dimension_numbers<[1], [0], [0], [1], [0, 0, 1, 1], [], []>} : vector<8x256xbf16>, vector<256x8xbf16>, vector<8x8xf32> -> vector<8x8xf32>
    %c0_37 = arith.constant 0 : index
    %c0_38 = arith.constant 0 : index
    %47 = vector.load %arg15[%c0_37, %c0_38] : memref<1x8xf32, #tpu.memory_space<vmem>>, vector<1x8xf32>
    %48 = vector.broadcast %47 : vector<1x8xf32> to vector<8x8xf32>
    %49 = arith.addf %46, %48 : vector<8x8xf32>
    %c0_39 = arith.constant 0 : index
    %c0_40 = arith.constant 0 : index
    %50 = vector.load %arg16[%c0_39, %c0_40] : memref<8x8xf32, #tpu.memory_space<vmem>>, vector<8x8xf32>
    tpu.vector_store %arg16[%c0_39, %c0_40], %49 {strides = array<i32>} : memref<8x8xf32, #tpu.memory_space<vmem>>, vector<8x8xf32>,
    return
  }
  func.func @transform_0(%arg0: i32) -> (i32, i32) {
    %c0_i32 = arith.constant 0 : i32
    %c0_i32_0 = arith.constant 0 : i32
    return %arg0, %c0_i32 : i32, i32
  }
  func.func @transform_1(%arg0: i32) -> (i32, i32) {
    %c0_i32 = arith.constant 0 : i32
    %c0_i32_0 = arith.constant 0 : i32
    return %arg0, %c0_i32 : i32, i32
  }
  func.func @transform_2(%arg0: i32) -> (i32, i32) {
    %c0_i32 = arith.constant 0 : i32
    %c0_i32_0 = arith.constant 0 : i32
    %c0_i32_1 = arith.constant 0 : i32
    return %c0_i32, %c0_i32_0 : i32, i32
  }
  func.func @transform_3(%arg0: i32) -> (i32, i32) {
    %c0_i32 = arith.constant 0 : i32
    %c0_i32_0 = arith.constant 0 : i32
    %c0_i32_1 = arith.constant 0 : i32
    return %c0_i32, %c0_i32_0 : i32, i32
  }
  func.func @transform_4(%arg0: i32) -> (i32, i32) {
    %c0_i32 = arith.constant 0 : i32
    %c0_i32_0 = arith.constant 0 : i32
    %c0_i32_1 = arith.constant 0 : i32
    return %c0_i32, %c0_i32_0 : i32, i32
  }
  func.func @transform_5(%arg0: i32) -> (i32, i32) {
    %c0_i32 = arith.constant 0 : i32
    %c0_i32_0 = arith.constant 0 : i32
    %c0_i32_1 = arith.constant 0 : i32
    return %c0_i32, %c0_i32_0 : i32, i32
  }
  func.func @transform_6(%arg0: i32) -> (i32, i32) {
    %c0_i32 = arith.constant 0 : i32
    %c0_i32_0 = arith.constant 0 : i32
    %c0_i32_1 = arith.constant 0 : i32
    return %c0_i32, %c0_i32_0 : i32, i32
  }
  func.func @transform_7(%arg0: i32) -> (i32, i32) {
    %c0_i32 = arith.constant 0 : i32
    %c0_i32_0 = arith.constant 0 : i32
    %c0_i32_1 = arith.constant 0 : i32
    return %c0_i32, %c0_i32_0 : i32, i32
  }
  func.func @transform_8(%arg0: i32) -> (i32, i32) {
    %c0_i32 = arith.constant 0 : i32
    %c0_i32_0 = arith.constant 0 : i32
    %c0_i32_1 = arith.constant 0 : i32
    return %c0_i32, %c0_i32_0 : i32, i32
  }
  func.func @transform_9(%arg0: i32) -> (i32, i32) {
    %c0_i32 = arith.constant 0 : i32
    %c0_i32_0 = arith.constant 0 : i32
    %c0_i32_1 = arith.constant 0 : i32
    return %c0_i32, %c0_i32_0 : i32, i32
  }
  func.func @transform_10(%arg0: i32) -> (i32, i32) {
    %c0_i32 = arith.constant 0 : i32
    %c0_i32_0 = arith.constant 0 : i32
    %c0_i32_1 = arith.constant 0 : i32
    return %c0_i32, %c0_i32_0 : i32, i32
  }
  func.func @transform_11(%arg0: i32) -> (i32, i32) {
    %c0_i32 = arith.constant 0 : i32
    %c0_i32_0 = arith.constant 0 : i32
    %c0_i32_1 = arith.constant 0 : i32
    return %c0_i32, %c0_i32_0 : i32, i32
  }
  func.func @transform_12(%arg0: i32) -> (i32, i32) {
    %c0_i32 = arith.constant 0 : i32
    %c0_i32_0 = arith.constant 0 : i32
    %c0_i32_1 = arith.constant 0 : i32
    return %c0_i32, %c0_i32_0 : i32, i32
  }
  func.func @transform_13(%arg0: i32) -> (i32, i32) {
    %c0_i32 = arith.constant 0 : i32
    %c0_i32_0 = arith.constant 0 : i32
    %c0_i32_1 = arith.constant 0 : i32
    return %c0_i32, %c0_i32_0 : i32, i32
  }
  func.func @transform_14(%arg0: i32) -> (i32, i32) {
    %c0_i32 = arith.constant 0 : i32
    %c0_i32_0 = arith.constant 0 : i32
    %c0_i32_1 = arith.constant 0 : i32
    return %c0_i32, %c0_i32_0 : i32, i32
  }
  func.func @transform_15(%arg0: i32) -> (i32, i32) {
    %c0_i32 = arith.constant 0 : i32
    %c0_i32_0 = arith.constant 0 : i32
    return %arg0, %c0_i32 : i32, i32
  }
}

</mosaic_0001>

<bundles_post_ra>
// kernel: diffusion_forward.1
= control target key start
LH: loop header
LB: loop body
LE: loop exit
PB: predicated region body
PF: predicated region fallthrough
CT: control target
= control target key end

     0   :  { %vm70_vm0 = vcmask 1041408   ;;  %v1752_v1 = vmov 0   ;;  %vm127_vm1 = vcmask 1043456   ;;  %vm66_vm2 = vcmask 31744   ;;  %s2316_s3 = inlined_call_operand.vmem [shape: bf16[4,256], index: 3, kind: input, shape index: {}]   ;;  %s2317_s1 = inlined_call_operand.vmem [shape: f32[8,4], index: 1, kind: input, shape index: {}]   ;;  %s2318_s2 = inlined_call_operand.vmem [shape: bf16[8,256], index: 2, kind: input, shape index: {}]   ;;  %s2319_s5 = inlined_call_operand.vmem [shape: bf16[256,256], index: 5, kind: input, shape index: {}]   ;;  %s2320_s0 = inlined_call_operand.vmem [shape: f32[8,8], index: 0, kind: input, shape index: {}]   ;;  %s2321_s7 = inlined_call_operand.vmem [shape: bf16[256,256], index: 7, kind: input, shape index: {}]   ;;  %s2322_s4 = inlined_call_operand.vmem [shape: f32[1,256], index: 4, kind: input, shape index: {}]   ;;  %s2323_s9 = inlined_call_operand.vmem [shape: bf16[256,256], index: 9, kind: input, shape index: {}]   ;;  %s2324_s6 = inlined_call_operand.vmem [shape: f32[1,256], index: 6, kind: input, shape index: {}]   ;;  %s2325_s11 = inlined_call_operand.vmem [shape: bf16[256,256], index: 11, kind: input, shape index: {}]   ;;  %s2326_s8 = inlined_call_operand.vmem [shape: f32[1,256], index: 8, kind: input, shape index: {}]   ;;  %s2327_s13 = inlined_call_operand.vmem [shape: bf16[256,8], index: 13, kind: input, shape index: {}]   ;;  %s2328_s10 = inlined_call_operand.vmem [shape: f32[1,256], index: 10, kind: input, shape index: {}]   ;;  %s2329_s12 = inlined_call_operand.vmem [shape: f32[1,256], index: 12, kind: input, shape index: {}]   ;;  %s2330_s14 = inlined_call_operand.vmem [shape: f32[1,8], index: 14, kind: input, shape index: {}]   ;;  %s2331_s15 = inlined_call_operand.vmem [shape: f32[8,8], index: 15, kind: output, shape index: {}]  }
   0x1   :  { %v1367_v0 = vld.sshfl [vmem:[%s2316_s3] sm:$0x33 pattern:$0x76325410]  ;;  %109 = vmatprep.mubr.bf16.mxu1 %v1752_v1  ;;  %v1544_v8 = vld [vmem:[%s2319_s5 + $0x4] ss:$8 sps:$4 sm:$0xff]  }
   0x2   :  { %v52_v2 = vld [vmem:[%s2317_s1] sm:$0xff]  ;;  %v65_v4 = vcombine.high %v1367_v0, %v1367_v0  ;;  %v72_v5 = vsel %vm70_vm0, %v1367_v0, 0  ;;  %v1547_v11 = vld [vmem:[%s2319_s5 + $0x14] ss:$8 sps:$4 sm:$0xff]   ;;  %395 = vmatprep.subr.bf16.mxu0 %v1544_v8  ;;  %v1549_v13 = vld [vmem:[%s2319_s5 + $0x10] ss:$8 sps:$4 sm:$0xff]   ;;  %v177_v8 = vlaneseq }
   0x3   :  { %v54_v3 = vld [vmem:[%s2318_s2] sm:$0xff]  ;;  %v55_v10 = vpack.c.bf16 %v52_v2, %v52_v2  ;;  %v1553_v17 = vld [vmem:[%s2319_s5 + $0x34] ss:$8 sps:$4 sm:$0xff]   ;;  %vm123_vm3 = vcmask 64512   ;;  %v1555_v19 = vld [vmem:[%s2319_s5 + $0x30] ss:$8 sps:$4 sm:$0xff]  }
   0x4   :  { %v1371_v6 = vcombine.high %v54_v3, %v54_v3  ;;  %v1370_v7 = vcombine.low %v54_v3, %v54_v3  ;;  %v1546_v9 = vld [vmem:[%s2319_s5] ss:$8 sps:$4 sm:$0xff]   ;;  %1368 = vmatprep.subr.msk.bf16.mxu1 %vm70_vm0, %v65_v4  ;;  %v1550_v14 = vld [vmem:[%s2319_s5 + $0x24] ss:$8 sps:$4 sm:$0xff]   ;;  %v1559_v22 = vld [vmem:[%s2319_s5 + $0x54] ss:$8 sps:$4 sm:$0xff]  }
   0x5   :  { %78 = vmatpush1.bf16.msra.mxu1 %v72_v5  ;;  %396 = vmatpush1.bf16.msra.mxu0 %v1546_v9  ;;  %v51_v15 = vld [vmem:[%s2320_s0] sm:$0xff]  ;;  %v1561_v23 = vld [vmem:[%s2319_s5 + $0x50] ss:$8 sps:$4 sm:$0xff]   ;;  %v1565_v26 = vld [vmem:[%s2319_s5 + $0x74] ss:$8 sps:$4 sm:$0xff]   ;;  %v178_v9 = vshrl.u32 %v177_v8, 7 }
   0x6   :  { %1372 = vmatprep.subr.msk.bf16.mxu1 %vm127_vm1, %v1371_v6  ;;  %v129_v12 = vsel %vm127_vm1, %v1370_v7, 0  ;;  %397 = vmatprep.subr.bf16.mxu0 %v1547_v11  ;;  %v1552_v16 = vld [vmem:[%s2319_s5 + $0x20] ss:$8 sps:$4 sm:$0xff]   ;;  %v53_v18 = vpack.c.bf16 %v51_v15, %v51_v15  ;;  %v1556_v20 = vld [vmem:[%s2319_s5 + $0x44] ss:$8 sps:$4 sm:$0xff]  }
   0x7   :  { %v1558_v21 = vld [vmem:[%s2319_s5 + $0x40] ss:$8 sps:$4 sm:$0xff]   ;;  %v1562_v24 = vld [vmem:[%s2319_s5 + $0x64] ss:$8 sps:$4 sm:$0xff]   ;;  %v1567_v27 = vld [vmem:[%s2319_s5 + $0x70] ss:$8 sps:$4 sm:$0xff]  }
   0x8   :  { %1369 = vmatmul.mubr.msk.bf16.vlgmr.msra.gmra.mrb[0].mxu1 %vm66_vm2, %v55_v10  ;;  %v1564_v25 = vld [vmem:[%s2319_s5 + $0x60] ss:$8 sps:$4 sm:$0xff]   ;;  %v1568_v28 = vld [vmem:[%s2319_s5 + $0x84] ss:$8 sps:$4 sm:$0xff]   ;;  %v1571_v30 = vld [vmem:[%s2319_s5 + $0x94] ss:$8 sps:$4 sm:$0xff]  }
   0x9   :  { %135 = vmatpush1.bf16.msra.mxu1 %v129_v12  ;;  %166 = vmatprep.mubr.bf16.mxu1 %v1752_v1  ;;  %v1570_v29 = vld [vmem:[%s2319_s5 + $0x80] ss:$8 sps:$4 sm:$0xff]   ;;  %v1573_v31 = vld [vmem:[%s2319_s5 + $0x90] ss:$8 sps:$4 sm:$0xff]   ;;  %v1574_v32 = vld [vmem:[%s2319_s5 + $0xa4] ss:$8 sps:$4 sm:$0xff]  }
   0xa   :  { %398 = vmatpush1.bf16.msra.mxu0 %v1549_v13  ;;  %v1576_v33 = vld [vmem:[%s2319_s5 + $0xa0] ss:$8 sps:$4 sm:$0xff]   ;;  %v1577_v34 = vld [vmem:[%s2319_s5 + $0xb4] ss:$8 sps:$4 sm:$0xff]   ;;  %v1579_v35 = vld [vmem:[%s2319_s5 + $0xb0] ss:$8 sps:$4 sm:$0xff]  }
   0xb   :  { %399 = vmatprep.subr.bf16.mxu0 %v1550_v14  ;;  %v1580_v36 = vld [vmem:[%s2319_s5 + $0xc4] ss:$8 sps:$4 sm:$0xff]   ;;  %v1582_v37 = vld [vmem:[%s2319_s5 + $0xc0] ss:$8 sps:$4 sm:$0xff]   ;;  %v1583_v38 = vld [vmem:[%s2319_s5 + $0xd4] ss:$8 sps:$4 sm:$0xff]  }
   0xc   :  { %v1585_v39 = vld [vmem:[%s2319_s5 + $0xd0] ss:$8 sps:$4 sm:$0xff]   ;;  %v1586_v40 = vld [vmem:[%s2319_s5 + $0xe4] ss:$8 sps:$4 sm:$0xff]   ;;  %v1588_v41 = vld [vmem:[%s2319_s5 + $0xe0] ss:$8 sps:$4 sm:$0xff]  }
   0xd   :  { %v1589_v42 = vld [vmem:[%s2319_s5 + $0xf4] ss:$8 sps:$4 sm:$0xff]   ;;  %v1591_v43 = vld [vmem:[%s2319_s5 + $0xf0] ss:$8 sps:$4 sm:$0xff]   ;;  %v1592_v44 = vld [vmem:[%s2321_s7] ss:$8 sps:$4 sm:$0xff]  }
   0xe   :  { %400 = vmatpush1.bf16.msra.mxu0 %v1552_v16  ;;  %v1594_v45 = vld [vmem:[%s2321_s7 + $0x4] ss:$8 sps:$4 sm:$0xff]   ;;  %v1597_v46 = vld [vmem:[%s2321_s7 + $0x14] ss:$8 sps:$4 sm:$0xff]   ;;  %v1595_v47 = vld [vmem:[%s2321_s7 + $0x10] ss:$8 sps:$4 sm:$0xff]  }
   0xf   :  { %401 = vmatprep.subr.bf16.mxu0 %v1553_v17  ;;  %644 = vmatprep.subr.bf16.mxu1 %v1594_v45  ;;  %v1600_v48 = vld [vmem:[%s2321_s7 + $0x24] ss:$8 sps:$4 sm:$0xff]   ;;  %v1598_v49 = vld [vmem:[%s2321_s7 + $0x20] ss:$8 sps:$4 sm:$0xff]   ;;  %v1603_v50 = vld [vmem:[%s2321_s7 + $0x34] ss:$8 sps:$4 sm:$0xff]  }
  0x10   :  { %1373 = vmatmul.mubr.msk.bf16.vlgmr.msra.gmra.mrb[4].mxu1 %vm123_vm3, %v53_v18  ;;  %v1601_v51 = vld [vmem:[%s2321_s7 + $0x30] ss:$8 sps:$4 sm:$0xff]   ;;  %v1606_v52 = vld [vmem:[%s2321_s7 + $0x44] ss:$8 sps:$4 sm:$0xff]   ;;  %v1604_v53 = vld [vmem:[%s2321_s7 + $0x40] ss:$8 sps:$4 sm:$0xff]  }
  0x11   :  { %645 = vmatpush1.bf16.msra.mxu1 %v1592_v44  ;;  %v1609_v54 = vld [vmem:[%s2321_s7 + $0x54] ss:$8 sps:$4 sm:$0xff]   ;;  %v1607_v55 = vld [vmem:[%s2321_s7 + $0x50] ss:$8 sps:$4 sm:$0xff]   ;;  %v1612_v56 = vld [vmem:[%s2321_s7 + $0x64] ss:$8 sps:$4 sm:$0xff]  }
  0x12   :  { %402 = vmatpush1.bf16.msra.mxu0 %v1555_v19  ;;  %646 = vmatprep.subr.bf16.mxu1 %v1597_v46  ;;  %v1610_v57 = vld [vmem:[%s2321_s7 + $0x60] ss:$8 sps:$4 sm:$0xff]   ;;  %v1615_v58 = vld [vmem:[%s2321_s7 + $0x74] ss:$8 sps:$4 sm:$0xff]   ;;  %v1613_v59 = vld [vmem:[%s2321_s7 + $0x70] ss:$8 sps:$4 sm:$0xff]  }
  0x13   :  { %403 = vmatprep.subr.bf16.mxu0 %v1556_v20  ;;  %v1618_v60 = vld [vmem:[%s2321_s7 + $0x84] ss:$8 sps:$4 sm:$0xff]   ;;  %v1616_v61 = vld [vmem:[%s2321_s7 + $0x80] ss:$8 sps:$4 sm:$0xff]   ;;  %v1621_v62 = vld [vmem:[%s2321_s7 + $0x94] ss:$8 sps:$4 sm:$0xff]  }
  0x14   :  { %v1619_v63 = vld [vmem:[%s2321_s7 + $0x90] ss:$8 sps:$4 sm:$0xff]   ;;  %v1624_v0 = vld [vmem:[%s2321_s7 + $0xa4] ss:$8 sps:$4 sm:$0xff]   ;;  %v1622_v1 = vld [vmem:[%s2321_s7 + $0xa0] ss:$8 sps:$4 sm:$0xff]  }
  0x15   :  { %647 = vmatpush1.bf16.msra.mxu1 %v1595_v47  ;;  %v1627_v2 = vld [vmem:[%s2321_s7 + $0xb4] ss:$8 sps:$4 sm:$0xff]   ;;  %v1625_v3 = vld [vmem:[%s2321_s7 + $0xb0] ss:$8 sps:$4 sm:$0xff]   ;;  %v1630_v4 = vld [vmem:[%s2321_s7 + $0xc4] ss:$8 sps:$4 sm:$0xff]  }
  0x16   :  { %404 = vmatpush1.bf16.msra.mxu0 %v1558_v21  ;;  %648 = vmatprep.subr.bf16.mxu1 %v1600_v48  ;;  %v1628_v5 = vld [vmem:[%s2321_s7 + $0xc0] ss:$8 sps:$4 sm:$0xff]   ;;  %v1633_v6 = vld [vmem:[%s2321_s7 + $0xd4] ss:$8 sps:$4 sm:$0xff]   ;;  %v1631_v7 = vld [vmem:[%s2321_s7 + $0xd0] ss:$8 sps:$4 sm:$0xff]  }
  0x17   :  { %405 = vmatprep.subr.bf16.mxu0 %v1559_v22  ;;  %v2028_v14 = vsub.s32 0, %v178_v9  ;;  %v175_v15 = vld [vmem:[%s2322_s4] sm:$0x3]  ;;  %v2033_v16 = vsub.s32 1, %v178_v9  ;;  %v1655_v44 = vld [vmem:[%s2323_s9 + $0x50] ss:$8 sps:$4 sm:$0xff]  }
  0x18   :  { %v1660_v45 = vld [vmem:[%s2323_s9 + $0x64] ss:$8 sps:$4 sm:$0xff]   ;;  %v1658_v46 = vld [vmem:[%s2323_s9 + $0x60] ss:$8 sps:$4 sm:$0xff]   ;;  %v1663_v47 = vld [vmem:[%s2323_s9 + $0x74] ss:$8 sps:$4 sm:$0xff]  }
  0x19   :  { %649 = vmatpush1.bf16.msra.mxu1 %v1598_v49  ;;  %v180_v17 = vrot.slane %v175_v15, %v2028_v14  ;;  %v184_v19 = vrot.slane %v175_v15, %v2033_v16  ;;  %v1661_v48 = vld [vmem:[%s2323_s9 + $0x70] ss:$8 sps:$4 sm:$0xff]   ;;  %v1666_v49 = vld [vmem:[%s2323_s9 + $0x84] ss:$8 sps:$4 sm:$0xff]   ;;  %v1688_v15 = vld [vmem:[%s2325_s11] ss:$8 sps:$4 sm:$0xff]  }
  0x1a   :  { %406 = vmatpush1.bf16.msra.mxu0 %v1561_v23  ;;  %650 = vmatprep.subr.bf16.mxu1 %v1603_v50  ;;  %v1664_v50 = vld [vmem:[%s2323_s9 + $0x80] ss:$8 sps:$4 sm:$0xff]  }
  0x1b   :  { %407 = vmatprep.subr.bf16.mxu0 %v1562_v24 }
  0x1d   :  { %651 = vmatpush1.bf16.msra.mxu1 %v1601_v51  ;;  %v1669_v51 = vld [vmem:[%s2323_s9 + $0x94] ss:$8 sps:$4 sm:$0xff]  }
  0x1e   :  { %408 = vmatpush1.bf16.msra.mxu0 %v1564_v25  ;;  %652 = vmatprep.subr.bf16.mxu1 %v1606_v52  ;;  %v1667_v52 = vld [vmem:[%s2323_s9 + $0x90] ss:$8 sps:$4 sm:$0xff]  }
  0x1f   :  { %409 = vmatprep.subr.bf16.mxu0 %v1565_v26 }
  0x21   :  { %653 = vmatpush1.bf16.msra.mxu1 %v1604_v53  ;;  %v1672_v53 = vld [vmem:[%s2323_s9 + $0xa4] ss:$8 sps:$4 sm:$0xff]  }
  0x22   :  { %410 = vmatpush1.bf16.msra.mxu0 %v1567_v27  ;;  %654 = vmatprep.subr.bf16.mxu1 %v1609_v54  ;;  %v1670_v54 = vld [vmem:[%s2323_s9 + $0xa0] ss:$8 sps:$4 sm:$0xff]  }
  0x23   :  { %411 = vmatprep.subr.bf16.mxu0 %v1568_v28 }
  0x25   :  { %655 = vmatpush1.bf16.msra.mxu1 %v1607_v55  ;;  %v1675_v55 = vld [vmem:[%s2323_s9 + $0xb4] ss:$8 sps:$4 sm:$0xff]  }
  0x26   :  { %412 = vmatpush1.bf16.msra.mxu0 %v1570_v29  ;;  %656 = vmatprep.subr.bf16.mxu1 %v1612_v56  ;;  %v1636_v29 = vld [vmem:[%s2321_s7 + $0xe4] ss:$8 sps:$4 sm:$0xff]   ;;  %v1673_v56 = vld [vmem:[%s2323_s9 + $0xb0] ss:$8 sps:$4 sm:$0xff]  }
  0x27   :  { %413 = vmatprep.subr.bf16.mxu0 %v1571_v30  ;;  %v1634_v30 = vld [vmem:[%s2321_s7 + $0xe0] ss:$8 sps:$4 sm:$0xff]  }
  0x29   :  { %657 = vmatpush1.bf16.msra.mxu1 %v1610_v57  ;;  %v1678_v57 = vld [vmem:[%s2323_s9 + $0xc4] ss:$8 sps:$4 sm:$0xff]  }
  0x2a   :  { %414 = vmatpush1.bf16.msra.mxu0 %v1573_v31  ;;  %658 = vmatprep.subr.bf16.mxu1 %v1615_v58  ;;  %v1639_v31 = vld [vmem:[%s2321_s7 + $0xf4] ss:$8 sps:$4 sm:$0xff]   ;;  %v1676_v58 = vld [vmem:[%s2323_s9 + $0xc0] ss:$8 sps:$4 sm:$0xff]  }
  0x2b   :  { %415 = vmatprep.subr.bf16.mxu0 %v1574_v32  ;;  %v1637_v32 = vld [vmem:[%s2321_s7 + $0xf0] ss:$8 sps:$4 sm:$0xff]  }
  0x2d   :  { %659 = vmatpush1.bf16.msra.mxu1 %v1613_v59  ;;  %v1681_v59 = vld [vmem:[%s2323_s9 + $0xd4] ss:$8 sps:$4 sm:$0xff]  }
  0x2e   :  { %416 = vmatpush1.bf16.msra.mxu0 %v1576_v33  ;;  %660 = vmatprep.subr.bf16.mxu1 %v1618_v60  ;;  %v1640_v33 = vld [vmem:[%s2323_s9] ss:$8 sps:$4 sm:$0xff]   ;;  %v1679_v60 = vld [vmem:[%s2323_s9 + $0xd0] ss:$8 sps:$4 sm:$0xff]  }
  0x2f   :  { %417 = vmatprep.subr.bf16.mxu0 %v1577_v34  ;;  %v1642_v34 = vld [vmem:[%s2323_s9 + $0x4] ss:$8 sps:$4 sm:$0xff]  }
  0x31   :  { %661 = vmatpush1.bf16.msra.mxu1 %v1616_v61  ;;  %v223_v61 = vld [vmem:[%s2324_s6] sm:$0x3] }
  0x32   :  { %418 = vmatpush1.bf16.msra.mxu0 %v1579_v35  ;;  %662 = vmatprep.subr.bf16.mxu1 %v1621_v62  ;;  %v1645_v35 = vld [vmem:[%s2323_s9 + $0x14] ss:$8 sps:$4 sm:$0xff]   ;;  %v228_v62 = vrot.slane %v223_v61, %v2028_v14 }
  0x33   :  { %419 = vmatprep.subr.bf16.mxu0 %v1580_v36  ;;  %v1643_v36 = vld [vmem:[%s2323_s9 + $0x10] ss:$8 sps:$4 sm:$0xff]  }
  0x35   :  { %663 = vmatpush1.bf16.msra.mxu1 %v1619_v63  ;;  %v232_v63 = vrot.slane %v223_v61, %v2033_v16  ;;  %v1736_v61 = vld [vmem:[%s2327_s13 + $0x40] sm:$0xff]  }
  0x36   :  { %420 = vmatpush1.bf16.msra.mxu0 %v1582_v37  ;;  %664 = vmatprep.subr.bf16.mxu1 %v1624_v0  ;;  %v1648_v37 = vld [vmem:[%s2323_s9 + $0x24] ss:$8 sps:$4 sm:$0xff]  }
  0x37   :  { %421 = vmatprep.subr.bf16.mxu0 %v1583_v38  ;;  %v1646_v38 = vld [vmem:[%s2323_s9 + $0x20] ss:$8 sps:$4 sm:$0xff]  }
  0x39   :  { %665 = vmatpush1.bf16.msra.mxu1 %v1622_v1 }
  0x3a   :  { %422 = vmatpush1.bf16.msra.mxu0 %v1585_v39  ;;  %666 = vmatprep.subr.bf16.mxu1 %v1627_v2  ;;  %v1651_v39 = vld [vmem:[%s2323_s9 + $0x34] ss:$8 sps:$4 sm:$0xff]  }
  0x3b   :  { %423 = vmatprep.subr.bf16.mxu0 %v1586_v40  ;;  %v1649_v40 = vld [vmem:[%s2323_s9 + $0x30] ss:$8 sps:$4 sm:$0xff]  }
  0x3d   :  { %667 = vmatpush1.bf16.msra.mxu1 %v1625_v3 }
  0x3e   :  { %424 = vmatpush1.bf16.msra.mxu0 %v1588_v41  ;;  %668 = vmatprep.subr.bf16.mxu1 %v1630_v4  ;;  %v1654_v41 = vld [vmem:[%s2323_s9 + $0x44] ss:$8 sps:$4 sm:$0xff]  }
  0x3f   :  { %425 = vmatprep.subr.bf16.mxu0 %v1589_v42  ;;  %v1652_v42 = vld [vmem:[%s2323_s9 + $0x40] ss:$8 sps:$4 sm:$0xff]  }
  0x41   :  { %669 = vmatpush1.bf16.msra.mxu1 %v1628_v5 }
  0x42   :  { %426 = vmatpush1.bf16.msra.mxu0 %v1591_v43  ;;  %670 = vmatprep.subr.bf16.mxu1 %v1633_v6  ;;  %v1657_v43 = vld [vmem:[%s2323_s9 + $0x54] ss:$8 sps:$4 sm:$0xff]  }
  0x43   :  { %893 = vmatprep.subr.bf16.mxu0 %v1642_v34  ;;  %v1717_v34 = vld [vmem:[%s2325_s11 + $0x94] ss:$8 sps:$4 sm:$0xff]  }
  0x45   :  { %671 = vmatpush1.bf16.msra.mxu1 %v1631_v7 }
  0x46   :  { %672 = vmatprep.subr.bf16.mxu1 %v1636_v29  ;;  %v1706_v29 = vld [vmem:[%s2325_s11 + $0x60] ss:$8 sps:$4 sm:$0xff]  }
  0x49   :  { %673 = vmatpush1.bf16.msra.mxu1 %v1634_v30  ;;  %v1711_v30 = vld [vmem:[%s2325_s11 + $0x74] ss:$8 sps:$4 sm:$0xff]  }
  0x4a   :  { %674 = vmatprep.subr.bf16.mxu1 %v1639_v31  ;;  %v1709_v31 = vld [vmem:[%s2325_s11 + $0x70] ss:$8 sps:$4 sm:$0xff]  }
  0x4d   :  { %675 = vmatpush1.bf16.msra.mxu1 %v1637_v32  ;;  %v1714_v32 = vld [vmem:[%s2325_s11 + $0x84] ss:$8 sps:$4 sm:$0xff]  }
  0xdb   :  { %v111_v10 = vpop.f32.mrb[0].mxu1 }
  0xdc   :  { %v113_v11 = vpop.f32.mrb[1].mxu1 }
  0xdd   :  { %v115_v12 = vpop.f32.mrb[2].mxu1 }
  0xde   :  { %v116_v13 = vpop.f32.mrb[3].mxu1  ;;  %v1687_v12 = vld [vmem:[%s2323_s9 + $0xf4] ss:$8 sps:$4 sm:$0xff]  }
  0xdf   :  { %v1685_v13 = vld [vmem:[%s2323_s9 + $0xf0] ss:$8 sps:$4 sm:$0xff]  }
  0xe3   :  { %v168_v18 = vpop.f32.mrb[4].mxu1 }
  0xe4   :  { %v169_v20 = vadd.f32 %v168_v18, %v111_v10  ;;  %v170_v21 = vpop.f32.mrb[5].mxu1  ;;  %v1684_v10 = vld [vmem:[%s2323_s9 + $0xe4] ss:$8 sps:$4 sm:$0xff]   ;;  %v1693_v18 = vld [vmem:[%s2325_s11 + $0x14] ss:$8 sps:$4 sm:$0xff]  }
  0xe5   :  { %v171_v22 = vadd.f32 %v170_v21, %v113_v11  ;;  %v172_v23 = vpop.f32.mrb[6].mxu1  ;;  %v1682_v11 = vld [vmem:[%s2323_s9 + $0xe0] ss:$8 sps:$4 sm:$0xff]  }
  0xe6   :  { %v187_v24 = vadd.f32 %v180_v17, %v169_v20  ;;  %v173_v25 = vpop.f32.mrb[7].mxu1  ;;  %v1690_v17 = vld [vmem:[%s2325_s11 + $0x4] ss:$8 sps:$4 sm:$0xff]   ;;  %v1694_v21 = vld [vmem:[%s2325_s11 + $0x20] ss:$8 sps:$4 sm:$0xff]  }
  0xe7   :  { %v188_v26 = vadd.f32 %v184_v19, %v171_v22  ;;  %1142 = vmatprep.subr.bf16.mxu1 %v1690_v17  ;;  %v1691_v19 = vld [vmem:[%s2325_s11 + $0x10] ss:$8 sps:$4 sm:$0xff]   ;;  %v1696_v20 = vld [vmem:[%s2325_s11 + $0x24] ss:$8 sps:$4 sm:$0xff]   ;;  %v1699_v22 = vld [vmem:[%s2325_s11 + $0x34] ss:$8 sps:$4 sm:$0xff]  }
  0xe8   :  { %v189_v28 = vpack.c.bf16 %v187_v24, %v187_v24  ;;  %v1697_v23 = vld [vmem:[%s2325_s11 + $0x30] ss:$8 sps:$4 sm:$0xff]   ;;  %v1702_v24 = vld [vmem:[%s2325_s11 + $0x44] ss:$8 sps:$4 sm:$0xff]   ;;  %v1700_v25 = vld [vmem:[%s2325_s11 + $0x40] ss:$8 sps:$4 sm:$0xff]  }
  0xe9   :  { %v190_v27 = vpack.c.bf16 %v188_v26, %v188_v26  ;;  %v1705_v26 = vld [vmem:[%s2325_s11 + $0x54] ss:$8 sps:$4 sm:$0xff]  }
  0xeb   :  { %427 = vmatprep.mubr.bf16.mxu0 %v190_v27  ;;  %v1703_v27 = vld [vmem:[%s2325_s11 + $0x50] ss:$8 sps:$4 sm:$0xff]  }
  0xec   :  { %428 = vmatmul.mubr.bf16.vlgmr.msra.gmra.mrb[0].mxu0 %v189_v28  ;;  %v1708_v28 = vld [vmem:[%s2325_s11 + $0x64] ss:$8 sps:$4 sm:$0xff]  }
  0xed   :  { %894 = vmatpush1.bf16.msra.mxu0 %v1640_v33  ;;  %v1712_v33 = vld [vmem:[%s2325_s11 + $0x80] ss:$8 sps:$4 sm:$0xff]  }
  0xee   :  { %895 = vmatprep.subr.bf16.mxu0 %v1645_v35  ;;  %v1715_v35 = vld [vmem:[%s2325_s11 + $0x90] ss:$8 sps:$4 sm:$0xff]  }
  0xf1   :  { %896 = vmatpush1.bf16.msra.mxu0 %v1643_v36  ;;  %v1720_v36 = vld [vmem:[%s2325_s11 + $0xa4] ss:$8 sps:$4 sm:$0xff]  }
  0xf2   :  { %897 = vmatprep.subr.bf16.mxu0 %v1648_v37  ;;  %v1718_v37 = vld [vmem:[%s2325_s11 + $0xa0] ss:$8 sps:$4 sm:$0xff]  }
  0xf5   :  { %898 = vmatpush1.bf16.msra.mxu0 %v1646_v38  ;;  %v1723_v38 = vld [vmem:[%s2325_s11 + $0xb4] ss:$8 sps:$4 sm:$0xff]  }
  0xf6   :  { %899 = vmatprep.subr.bf16.mxu0 %v1651_v39  ;;  %v1721_v39 = vld [vmem:[%s2325_s11 + $0xb0] ss:$8 sps:$4 sm:$0xff]  }
  0xf9   :  { %900 = vmatpush1.bf16.msra.mxu0 %v1649_v40  ;;  %v1726_v40 = vld [vmem:[%s2325_s11 + $0xc4] ss:$8 sps:$4 sm:$0xff]  }
  0xfa   :  { %901 = vmatprep.subr.bf16.mxu0 %v1654_v41  ;;  %v1724_v41 = vld [vmem:[%s2325_s11 + $0xc0] ss:$8 sps:$4 sm:$0xff]  }
  0xfd   :  { %902 = vmatpush1.bf16.msra.mxu0 %v1652_v42  ;;  %v1729_v42 = vld [vmem:[%s2325_s11 + $0xd4] ss:$8 sps:$4 sm:$0xff]  }
  0xfe   :  { %903 = vmatprep.subr.bf16.mxu0 %v1657_v43  ;;  %v1727_v43 = vld [vmem:[%s2325_s11 + $0xd0] ss:$8 sps:$4 sm:$0xff]  }
 0x101   :  { %904 = vmatpush1.bf16.msra.mxu0 %v1655_v44  ;;  %v472_v44 = vld [vmem:[%s2326_s8] sm:$0x3] }
 0x102   :  { %905 = vmatprep.subr.bf16.mxu0 %v1660_v45  ;;  %v477_v45 = vrot.slane %v472_v44, %v2028_v14 }
 0x105   :  { %906 = vmatpush1.bf16.msra.mxu0 %v1658_v46  ;;  %v481_v46 = vrot.slane %v472_v44, %v2033_v16 }
 0x106   :  { %907 = vmatprep.subr.bf16.mxu0 %v1663_v47 }
 0x109   :  { %908 = vmatpush1.bf16.msra.mxu0 %v1661_v48 }
 0x10a   :  { %909 = vmatprep.subr.bf16.mxu0 %v1666_v49 }
 0x10d   :  { %910 = vmatpush1.bf16.msra.mxu0 %v1664_v50 }
 0x10e   :  { %911 = vmatprep.subr.bf16.mxu0 %v1669_v51 }
 0x111   :  { %912 = vmatpush1.bf16.msra.mxu0 %v1667_v52 }
 0x112   :  { %913 = vmatprep.subr.bf16.mxu0 %v1672_v53 }
 0x115   :  { %914 = vmatpush1.bf16.msra.mxu0 %v1670_v54 }
 0x116   :  { %915 = vmatprep.subr.bf16.mxu0 %v1675_v55 }
 0x119   :  { %916 = vmatpush1.bf16.msra.mxu0 %v1673_v56 }
 0x11a   :  { %917 = vmatprep.subr.bf16.mxu0 %v1678_v57  ;;  %v1732_v57 = vld [vmem:[%s2325_s11 + $0xe4] ss:$8 sps:$4 sm:$0xff]  }
 0x11d   :  { %918 = vmatpush1.bf16.msra.mxu0 %v1676_v58  ;;  %v1730_v58 = vld [vmem:[%s2325_s11 + $0xe0] ss:$8 sps:$4 sm:$0xff]  }
 0x11e   :  { %919 = vmatprep.subr.bf16.mxu0 %v1681_v59  ;;  %v1735_v59 = vld [vmem:[%s2325_s11 + $0xf4] ss:$8 sps:$4 sm:$0xff]  }
 0x121   :  { %920 = vmatpush1.bf16.msra.mxu0 %v1679_v60  ;;  %v1733_v60 = vld [vmem:[%s2325_s11 + $0xf0] ss:$8 sps:$4 sm:$0xff]  }
 0x122   :  { %921 = vmatprep.subr.bf16.mxu0 %v1684_v10 }
 0x125   :  { %922 = vmatpush1.bf16.msra.mxu0 %v1682_v11 }
 0x126   :  { %923 = vmatprep.subr.bf16.mxu0 %v1687_v12 }
 0x129   :  { %924 = vmatpush1.bf16.msra.mxu0 %v1685_v13 }
 0x12a   :  { %1519 = vmatprep.subr.bf16.mxu0 %v1736_v61 }
 0x1bf   :  { %v429_v0 = vpop.f32.mrb[0].mxu0 }
 0x1c0   :  { %v430_v1 = vadd.f32 %v429_v0, %v228_v62  ;;  %v431_v2 = vpop.f32.mrb[1].mxu0  ;;  %v1737_v62 = vld [vmem:[%s2327_s13] sm:$0xff]   ;;  %v1739_v0 = vld [vmem:[%s2327_s13 + $0x8] sm:$0xff]  }
 0x1c1   :  { %v432_v3 = vadd.f32 %v431_v2, %v232_v63  ;;  %v433_v4 = vpop.f32.mrb[2].mxu0  ;;  %v1738_v63 = vld [vmem:[%s2327_s13 + $0x48] sm:$0xff]   ;;  %v1741_v2 = vld [vmem:[%s2327_s13 + $0x10] sm:$0xff]  }
 0x1c2   :  { %v436_v5 = vmax.f32 %v430_v1, 0.0  ;;  %v434_v6 = vpop.f32.mrb[3].mxu0  ;;  %v1740_v1 = vld [vmem:[%s2327_s13 + $0x50] sm:$0xff]   ;;  %v1743_v4 = vld [vmem:[%s2327_s13 + $0x18] sm:$0xff]  }
 0x1c3   :  { %v437_v7 = vmax.f32 %v432_v3, 0.0  ;;  %v1742_v3 = vld [vmem:[%s2327_s13 + $0x58] sm:$0xff]   ;;  %v1745_v6 = vld [vmem:[%s2327_s13 + $0x20] sm:$0xff]  }
 0x1c4   :  { %v438_v9 = vpack.c.bf16 %v436_v5, %v436_v5  ;;  %v1744_v5 = vld [vmem:[%s2327_s13 + $0x60] sm:$0xff]  }
 0x1c5   :  { %v439_v8 = vpack.c.bf16 %v437_v7, %v437_v7  ;;  %v1746_v7 = vld [vmem:[%s2327_s13 + $0x68] sm:$0xff]  }
 0x1c7   :  { %676 = vmatprep.mubr.bf16.mxu1 %v439_v8  ;;  %v1747_v8 = vld [vmem:[%s2327_s13 + $0x28] sm:$0xff]  }
 0x1c8   :  { %677 = vmatmul.mubr.bf16.vlgmr.msra.gmra.mrb[8].mxu1 %v438_v9  ;;  %v721_v9 = vld [vmem:[%s2328_s10] sm:$0x3] }
 0x1c9   :  { %1143 = vmatpush1.bf16.msra.mxu1 %v1688_v15  ;;  %v726_v10 = vrot.slane %v721_v9, %v2028_v14  ;;  %v730_v11 = vrot.slane %v721_v9, %v2033_v16 }
 0x1ca   :  { %1144 = vmatprep.subr.bf16.mxu1 %v1693_v18 }
 0x1cd   :  { %1145 = vmatpush1.bf16.msra.mxu1 %v1691_v19 }
 0x1ce   :  { %1146 = vmatprep.subr.bf16.mxu1 %v1696_v20 }
 0x1d1   :  { %1147 = vmatpush1.bf16.msra.mxu1 %v1694_v21 }
 0x1d2   :  { %1148 = vmatprep.subr.bf16.mxu1 %v1699_v22 }
 0x1d5   :  { %1149 = vmatpush1.bf16.msra.mxu1 %v1697_v23 }
 0x1d6   :  { %1150 = vmatprep.subr.bf16.mxu1 %v1702_v24  ;;  %v1748_v24 = vld [vmem:[%s2327_s13 + $0x70] sm:$0xff]  }
 0x1d9   :  { %1151 = vmatpush1.bf16.msra.mxu1 %v1700_v25  ;;  %v1749_v25 = vld [vmem:[%s2327_s13 + $0x30] sm:$0xff]  }
 0x1da   :  { %1152 = vmatprep.subr.bf16.mxu1 %v1705_v26  ;;  %v1750_v26 = vld [vmem:[%s2327_s13 + $0x78] sm:$0xff]  }
 0x1dd   :  { %1153 = vmatpush1.bf16.msra.mxu1 %v1703_v27  ;;  %v1751_v27 = vld [vmem:[%s2327_s13 + $0x38] sm:$0xff]  }
 0x1de   :  { %1154 = vmatprep.subr.bf16.mxu1 %v1708_v28  ;;  %v970_v28 = vld [vmem:[%s2329_s12] sm:$0x3] }
 0x1e1   :  { %1155 = vmatpush1.bf16.msra.mxu1 %v1706_v29  ;;  %v975_v29 = vrot.slane %v970_v28, %v2028_v14 }
 0x1e2   :  { %1156 = vmatprep.subr.bf16.mxu1 %v1711_v30  ;;  %v979_v30 = vrot.slane %v970_v28, %v2033_v16 }
 0x1e5   :  { %1157 = vmatpush1.bf16.msra.mxu1 %v1709_v31 }
 0x1e6   :  { %1158 = vmatprep.subr.bf16.mxu1 %v1714_v32 }
 0x1e9   :  { %1159 = vmatpush1.bf16.msra.mxu1 %v1712_v33 }
 0x1ea   :  { %1160 = vmatprep.subr.bf16.mxu1 %v1717_v34 }
 0x1ed   :  { %1161 = vmatpush1.bf16.msra.mxu1 %v1715_v35 }
 0x1ee   :  { %1162 = vmatprep.subr.bf16.mxu1 %v1720_v36 }
 0x1f1   :  { %1163 = vmatpush1.bf16.msra.mxu1 %v1718_v37 }
 0x1f2   :  { %1164 = vmatprep.subr.bf16.mxu1 %v1723_v38 }
 0x1f5   :  { %1165 = vmatpush1.bf16.msra.mxu1 %v1721_v39 }
 0x1f6   :  { %1166 = vmatprep.subr.bf16.mxu1 %v1726_v40 }
 0x1f9   :  { %1167 = vmatpush1.bf16.msra.mxu1 %v1724_v41 }
 0x1fa   :  { %1168 = vmatprep.subr.bf16.mxu1 %v1729_v42  ;;  %v1502_v42 = vld [vmem:[%s2330_s14] ss:$0 sm:$0xff] }
 0x1fd   :  { %1169 = vmatpush1.bf16.msra.mxu1 %v1727_v43 }
 0x1fe   :  { %1170 = vmatprep.subr.bf16.mxu1 %v1732_v57 }
 0x201   :  { %1171 = vmatpush1.bf16.msra.mxu1 %v1730_v58 }
 0x202   :  { %1172 = vmatprep.subr.bf16.mxu1 %v1735_v59 }
 0x205   :  { %1173 = vmatpush1.bf16.msra.mxu1 %v1733_v60 }
 0x29b   :  { %v678_v47 = vpop.f32.mrb[8].mxu1 }
 0x29c   :  { %v679_v48 = vadd.f32 %v678_v47, %v477_v45  ;;  %v680_v49 = vpop.f32.mrb[9].mxu1 }
 0x29d   :  { %v681_v50 = vadd.f32 %v680_v49, %v481_v46  ;;  %v682_v51 = vpop.f32.mrb[10].mxu1 }
 0x29e   :  { %v685_v52 = vmax.f32 %v679_v48, 0.0  ;;  %v683_v53 = vpop.f32.mrb[11].mxu1 }
 0x29f   :  { %v686_v54 = vmax.f32 %v681_v50, 0.0 }
 0x2a0   :  { %v687_v56 = vpack.c.bf16 %v685_v52, %v685_v52 }
 0x2a1   :  { %v688_v55 = vpack.c.bf16 %v686_v54, %v686_v54 }
 0x2a3   :  { %925 = vmatprep.mubr.bf16.mxu0 %v688_v55 }
 0x2a4   :  { %926 = vmatmul.mubr.bf16.vlgmr.msra.gmra.mrb[4].mxu0 %v687_v56 }
 0x2a5   :  { %1520 = vmatpush3.bf16.msra.mxu0 %v1737_v62 }
 0x2a6   :  { %1521 = vmatprep.subr.bf16.mxu0 %v1738_v63 }
 0x2a9   :  { %1522 = vmatpush3.bf16.msra.mxu0 %v1739_v0 }
 0x2aa   :  { %1523 = vmatprep.subr.bf16.mxu0 %v1740_v1 }
 0x2ad   :  { %1524 = vmatpush3.bf16.msra.mxu0 %v1741_v2 }
 0x2ae   :  { %1525 = vmatprep.subr.bf16.mxu0 %v1742_v3 }
 0x2b1   :  { %1526 = vmatpush3.bf16.msra.mxu0 %v1743_v4 }
 0x2b2   :  { %1527 = vmatprep.subr.bf16.mxu0 %v1744_v5 }
 0x2b5   :  { %1528 = vmatpush3.bf16.msra.mxu0 %v1745_v6 }
 0x2b6   :  { %1529 = vmatprep.subr.bf16.mxu0 %v1746_v7 }
 0x2b9   :  { %1530 = vmatpush3.bf16.msra.mxu0 %v1747_v8 }
 0x2ba   :  { %1531 = vmatprep.subr.bf16.mxu0 %v1748_v24 }
 0x2bd   :  { %1532 = vmatpush3.bf16.msra.mxu0 %v1749_v25 }
 0x2be   :  { %1533 = vmatprep.subr.bf16.mxu0 %v1750_v26 }
 0x2c1   :  { %1534 = vmatpush3.bf16.msra.mxu0 %v1751_v27 }
 0x377   :  { %v927_v12 = vpop.f32.mrb[4].mxu0 }
 0x378   :  { %v928_v13 = vadd.f32 %v927_v12, %v726_v10  ;;  %v929_v15 = vpop.f32.mrb[5].mxu0 }
 0x379   :  { %v930_v17 = vadd.f32 %v929_v15, %v730_v11  ;;  %v931_v18 = vpop.f32.mrb[6].mxu0 }
 0x37a   :  { %v934_v19 = vmax.f32 %v928_v13, 0.0  ;;  %v932_v20 = vpop.f32.mrb[7].mxu0 }
 0x37b   :  { %v935_v21 = vmax.f32 %v930_v17, 0.0 }
 0x37c   :  { %v936_v23 = vpack.c.bf16 %v934_v19, %v934_v19 }
 0x37d   :  { %v937_v22 = vpack.c.bf16 %v935_v21, %v935_v21 }
 0x37f   :  { %1174 = vmatprep.mubr.bf16.mxu1 %v937_v22 }
 0x380   :  { %1175 = vmatmul.mubr.bf16.vlgmr.msra.gmra.mrb[12].mxu1 %v936_v23 }
 0x453   :  { %v1176_v31 = vpop.f32.mrb[12].mxu1 }
 0x454   :  { %v1177_v32 = vadd.f32 %v1176_v31, %v975_v29  ;;  %v1178_v33 = vpop.f32.mrb[13].mxu1 }
 0x455   :  { %v1179_v34 = vadd.f32 %v1178_v33, %v979_v30  ;;  %v1180_v35 = vpop.f32.mrb[14].mxu1 }
 0x456   :  { %v1183_v36 = vmax.f32 %v1177_v32, 0.0  ;;  %v1181_v37 = vpop.f32.mrb[15].mxu1 }
 0x457   :  { %v1184_v38 = vmax.f32 %v1179_v34, 0.0 }
 0x458   :  { %v1185_v40 = vpack.c.bf16 %v1183_v36, %v1183_v36 }
 0x459   :  { %v1186_v39 = vpack.c.bf16 %v1184_v38, %v1184_v38 }
 0x45b   :  { %1354 = vmatprep.mubr.bf16.mxu0 %v1186_v39 }
 0x45c   :  { %1355 = vmatmul.mubr.bf16.vlgmr.msra.gmra.mrb[8].mxu0 %v1185_v40 }
 0x52f   :  { %v1535_v41 = vpop.f32.mrb[8].mxu0 }
 0x530   :  { %v1536_v14 = vpop.f32.mrb[9].mxu0 }
 0x531   :  { %v1537_v43 = vadd.f32 %v1536_v14, %v1535_v41  ;;  %v1538_v16 = vpop.f32.mrb[10].mxu0 }
 0x532   :  { %v1539_v44 = vpop.f32.mrb[11].mxu0 }
 0x533   :  { %v1357_v45 = vadd.f32 %v1537_v43, %v1502_v42 }
 0x535   :  { %1362 = vst.msk [vmem:[%s2331_s15] sm:$0xff] %vm123_vm3, %v1357_v45 }

</bundles_post_ra>
